<compile_context>
chip_gen: v7x
topology: tpu7x:2x2x1
jax: 0.10.0
libtpu: 0.0.40
codegen_flags: <defaults>
</compile_context>

<pallas_src>
import jax
import jax.numpy as jnp
from jax import lax
from jax.experimental import pallas as pl
from jax.experimental.pallas import tpu as pltpu

T, B, I, H = 8, 2, 9, 32      # seq_len, batch, input_size, hidden_size
IP = 16                       # input feature dim padded 9 -> 16 (+1 bias col)
GW = 8 * H                    # fused gate width: [i_f i_b f_f f_b g_f g_b o_f o_b]


def _bilstm_fc_kernel(x_ref, w_ref, out_ref, h_scr):
    # ---- static slices of the packed weight slab (free) ---------------------
    w_in = w_ref[0:2 * IP, :]                         # (32, 256)  input proj (bias folded)
    w_hh = w_ref[2 * IP:2 * IP + 2 * H, :]            # (64, 256)  block-diag recurrent
    fc_row = w_ref[2 * IP + 2 * H:2 * IP + 2 * H + 1, :]   # (1, 256)  [fcw | fcb | 0...]

    # ---- one-shot fused input projection (both directions, all gates) -------
    # x_ref rows t*B:(t+1)*B = [x[t] | x[T-1-t]]; backward gate columns of w_in
    # only read the second half, so xp row-block t already holds the correct
    # pre-activation contribution for BOTH directions at interleaved step t.
    xp = jnp.dot(x_ref[...], w_in, preferred_element_type=jnp.float32)   # (T*B, 256)

    h = jnp.zeros((B, 2 * H), jnp.float32)     # [h_fwd(t) | h_bwd(T-1-t)]
    c = jnp.zeros((B, 2 * H), jnp.float32)

    # ---- fully unrolled, direction-interleaved recurrence --------------------
    for t in range(T):
        tb = T - 1 - t
        pre = xp[t * B:(t + 1) * B, :] + jnp.dot(
            h, w_hh, preferred_element_type=jnp.float32)
        th = jnp.tanh(pre)                     # single EUP pass over all gates
        # sigmoid(z) == 0.5*tanh(0.5*z)+0.5 ; the 0.5 scale is folded into the
        # i/f/o columns of w_in / w_hh (and their bias rows).
        i_g = 0.5 * th[:, 0 * H:2 * H] + 0.5
        f_g = 0.5 * th[:, 2 * H:4 * H] + 0.5
        g_g = th[:, 4 * H:6 * H]
        o_g = 0.5 * th[:, 6 * H:8 * H] + 0.5
        c = f_g * c + i_g * g_g
        h = o_g * jnp.tanh(c)
        # per-step scratch stores (static offsets, idle vst slot)
        h_scr[t * B:(t + 1) * B, 0:H] = h[:, 0:H]          # fwd hidden @ time t
        h_scr[tb * B:(tb + 1) * B, H:2 * H] = h[:, H:2 * H]  # bwd hidden @ time T-1-t

    # ---- Linear(2H -> 1): one multiply + lane reduce, single output store ----
    fcw = fc_row[:, 0:2 * H]                  # (1, 64)
    fcb = fc_row[:, 2 * H:2 * H + 1]          # (1, 1)
    y = jnp.sum(h_scr[...] * fcw, axis=-1, keepdims=True) + fcb
    out_ref[...] = y                          # (T*B, 1), one store


def lstm_forward(x, wslab):
    Tn, Bn, In = x.shape
    # Dense 2-D kernel input: rows t*B:(t+1)*B = [x[t] | x[T-1-t]], each half
    # padded to IP features with a constant-1.0 column at index I that carries
    # the (folded) LSTM biases.
    x2 = x.reshape(Tn * Bn, In)
    ones = jnp.ones((Tn * Bn, 1), x.dtype)
    zpad = jnp.zeros((Tn * Bn, IP - In - 1), x.dtype)
    x_fwd = jnp.concatenate([x2, ones, zpad], axis=-1)                 # (T*B, IP)
    x_bwd = x_fwd.reshape(Tn, Bn, IP)[::-1].reshape(Tn * Bn, IP)       # time-reversed
    x_cat = jnp.concatenate([x_fwd, x_bwd], axis=-1)                   # (T*B, 2*IP)

    vmem = pl.BlockSpec(memory_space=pltpu.MemorySpace.VMEM)
    y = pl.pallas_call(
        _bilstm_fc_kernel,
        out_shape=jax.ShapeDtypeStruct((Tn * Bn, 1), jnp.float32),
        in_specs=[vmem, vmem],
        out_specs=vmem,
        scratch_shapes=[pltpu.VMEM((Tn * Bn, 2 * H), jnp.float32)],
    )(x_cat, wslab)
    return y.reshape(Tn, Bn, 1)


def init_params(key):
    # Deterministic init mirroring PyTorch's U(-1/sqrt(fan), 1/sqrt(fan)),
    # in native PyTorch layouts (gate order i, f, g, o).
    k = 1.0 / jnp.sqrt(jnp.float32(H))
    keys = jax.random.split(key, 10)
    u = lambda kk, shape, lim: jax.random.uniform(kk, shape, jnp.float32, -lim, lim)
    wih_f = u(keys[0], (4 * H, I), k); whh_f = u(keys[1], (4 * H, H), k)
    bih_f = u(keys[2], (4 * H,), k);   bhh_f = u(keys[3], (4 * H,), k)
    wih_b = u(keys[4], (4 * H, I), k); whh_b = u(keys[5], (4 * H, H), k)
    bih_b = u(keys[6], (4 * H,), k);   bhh_b = u(keys[7], (4 * H,), k)
    k2 = 1.0 / jnp.sqrt(jnp.float32(2 * H))
    fcw = u(keys[8], (1, 2 * H), k2)
    fcb = u(keys[9], (1,), k2)
    return (wih_f, whh_f, bih_f, bhh_f, wih_b, whh_b, bih_b, bhh_b, fcw, fcb)


def prepare_params(pt_params):
    """Repack PyTorch-layout params into ONE packed weight slab (97, 256).

    Rows 0:2*IP      fused input projection (forward half rows 0:IP, backward
                     half rows IP:2*IP); biases live on rows I and IP+I (the
                     constant-1.0 feature columns of x_cat).
    Rows 2*IP:+2H    block-diagonal recurrent weights.
    Last row         [fc weight (64) | fc bias (1) | zeros].
    Fused gate columns: [i_f i_b f_f f_b g_f g_b o_f o_b], each H lanes; the
    0.5 pre-scale of the tanh-based sigmoid is folded into i/f/o columns.
    """
    (wih_f, whh_f, bih_f, bhh_f,
     wih_b, whh_b, bih_b, bhh_b, fcw, fcb) = pt_params

    w_in = jnp.zeros((2 * IP, GW), jnp.float32)
    w_hh = jnp.zeros((2 * H, GW), jnp.float32)
    dirs = [(wih_f, whh_f, bih_f + bhh_f), (wih_b, whh_b, bih_b + bhh_b)]
    for gate in range(4):                     # i, f, g, o
        s = 1.0 if gate == 2 else 0.5         # g stays tanh, others sigmoid
        for d, (wih, whh, bsum) in enumerate(dirs):
            col = (2 * gate + d) * H
            w_in = w_in.at[d * IP:d * IP + I, col:col + H].set(
                s * wih[gate * H:(gate + 1) * H, :].T)
            w_in = w_in.at[d * IP + I, col:col + H].set(      # bias -> ones column
                s * bsum[gate * H:(gate + 1) * H])
            w_hh = w_hh.at[d * H:(d + 1) * H, col:col + H].set(
                s * whh[gate * H:(gate + 1) * H, :].T)
    fc_row = jnp.zeros((1, GW), jnp.float32)
    fc_row = fc_row.at[0, 0:2 * H].set(fcw[0, :])
    fc_row = fc_row.at[0, 2 * H].set(fcb[0])
    return jnp.concatenate([w_in, w_hh, fc_row], axis=0)      # (97, 256)


def ref_forward(x, pt_params):
    # Pure-JAX reference of the PyTorch module (for correctness check).
    (wih_f, whh_f, bih_f, bhh_f,
     wih_b, whh_b, bih_b, bhh_b, fcw, fcb) = pt_params

    def run(wih, whh, bih, bhh, xs):
        def step(carry, xt):
            h, c = carry
            gates = xt @ wih.T + h @ whh.T + bih + bhh
            i = jax.nn.sigmoid(gates[:, :H])
            f = jax.nn.sigmoid(gates[:, H:2 * H])
            g = jnp.tanh(gates[:, 2 * H:3 * H])
            o = jax.nn.sigmoid(gates[:, 3 * H:])
            c = f * c + i * g
            h = o * jnp.tanh(c)
            return (h, c), h

        h0 = jnp.zeros((xs.shape[1], H), jnp.float32)
        _, hs = lax.scan(step, (h0, jnp.zeros_like(h0)), xs)
        return hs

    hf = run(wih_f, whh_f, bih_f, bhh_f, x)
    hb = run(wih_b, whh_b, bih_b, bhh_b, x[::-1])[::-1]
    return jnp.concatenate([hf, hb], axis=-1) @ fcw.T + fcb


if __name__ == "__main__":
    key = jax.random.PRNGKey(0)
    pkey, xkey = jax.random.split(key)
    pt_params = init_params(pkey)
    wslab = prepare_params(pt_params)
    x = jax.random.normal(xkey, (T, B, I), jnp.float32)

    out = jax.block_until_ready(lstm_forward(x, wslab))
    ref = ref_forward(x, pt_params)

    assert out.shape == (T, B, 1), out.shape
    assert jnp.allclose(out, ref, atol=1e-4, rtol=1e-4), \
        float(jnp.max(jnp.abs(out - ref)))
    print("KERNEL_OK")
</pallas_src>

<mosaic_0001>
module attributes {stable_mosaic.version = 11 : i64} {
  func.func @_bilstm_fc_kernel(%arg0: memref<16x32xf32, #tpu.memory_space<vmem>>, %arg1: memref<97x256xf32, #tpu.memory_space<vmem>>, %arg2: memref<16x1xf32, #tpu.memory_space<vmem>>, %arg3: memref<16x64xf32, #tpu.memory_space<vmem>>) attributes {dimension_semantics = [], scalar_prefetch = 0 : i64, scratch_operands = 1 : i64, tpu.core_type = #tpu.core_type<tc>} {
    %c0 = arith.constant 0 : index
    %c0_0 = arith.constant 0 : index
    %0 = vector.load %arg1[%c0, %c0_0] : memref<97x256xf32, #tpu.memory_space<vmem>>, vector<32x256xf32>
    %c32 = arith.constant 32 : index
    %c0_1 = arith.constant 0 : index
    %1 = vector.load %arg1[%c32, %c0_1] : memref<97x256xf32, #tpu.memory_space<vmem>>, vector<64x256xf32>
    %c96 = arith.constant 96 : index
    %c0_2 = arith.constant 0 : index
    %2 = vector.load %arg1[%c96, %c0_2] : memref<97x256xf32, #tpu.memory_space<vmem>>, vector<1x256xf32>
    %c0_3 = arith.constant 0 : index
    %c0_4 = arith.constant 0 : index
    %3 = vector.load %arg0[%c0_3, %c0_4] : memref<16x32xf32, #tpu.memory_space<vmem>>, vector<16x32xf32>
    %cst = arith.constant dense<0.000000e+00> : vector<16x256xf32>
    %4 = tpu.matmul %3, %0, %cst {dimension_numbers = #tpu.dot_dimension_numbers<[1], [0], [0], [1], [0, 0, 1, 1], [], []>} : vector<16x32xf32>, vector<32x256xf32>, vector<16x256xf32> -> vector<16x256xf32>
    %cst_5 = arith.constant 0.000000e+00 : f32
    %5 = vector.broadcast %cst_5 : f32 to vector<2x64xf32>
    %cst_6 = arith.constant 0.000000e+00 : f32
    %6 = vector.broadcast %cst_6 : f32 to vector<2x64xf32>
    %7 = vector.extract_strided_slice %4 {offsets = [0, 0], sizes = [2, 256], strides = [1, 1]} : vector<16x256xf32> to vector<2x256xf32>
    %cst_7 = arith.constant dense<0.000000e+00> : vector<2x256xf32>
    %8 = tpu.matmul %5, %1, %cst_7 {dimension_numbers = #tpu.dot_dimension_numbers<[1], [0], [0], [1], [0, 0, 1, 1], [], []>} : vector<2x64xf32>, vector<64x256xf32>, vector<2x256xf32> -> vector<2x256xf32>
    %9 = arith.addf %7, %8 : vector<2x256xf32>
    %10 = math.tanh %9 : vector<2x256xf32>
    %11 = vector.extract_strided_slice %10 {offsets = [0, 0], sizes = [2, 64], strides = [1, 1]} : vector<2x256xf32> to vector<2x64xf32>
    %cst_8 = arith.constant 5.000000e-01 : f32
    %12 = vector.broadcast %cst_8 : f32 to vector<2x64xf32>
    %13 = arith.mulf %12, %11 : vector<2x64xf32>
    %cst_9 = arith.constant 5.000000e-01 : f32
    %14 = vector.broadcast %cst_9 : f32 to vector<2x64xf32>
    %15 = arith.addf %13, %14 : vector<2x64xf32>
    %16 = vector.extract_strided_slice %10 {offsets = [0, 64], sizes = [2, 64], strides = [1, 1]} : vector<2x256xf32> to vector<2x64xf32>
    %cst_10 = arith.constant 5.000000e-01 : f32
    %17 = vector.broadcast %cst_10 : f32 to vector<2x64xf32>
    %18 = arith.mulf %17, %16 : vector<2x64xf32>
    %cst_11 = arith.constant 5.000000e-01 : f32
    %19 = vector.broadcast %cst_11 : f32 to vector<2x64xf32>
    %20 = arith.addf %18, %19 : vector<2x64xf32>
    %21 = vector.extract_strided_slice %10 {offsets = [0, 128], sizes = [2, 64], strides = [1, 1]} : vector<2x256xf32> to vector<2x64xf32>
    %22 = vector.extract_strided_slice %10 {offsets = [0, 192], sizes = [2, 64], strides = [1, 1]} : vector<2x256xf32> to vector<2x64xf32>
    %cst_12 = arith.constant 5.000000e-01 : f32
    %23 = vector.broadcast %cst_12 : f32 to vector<2x64xf32>
    %24 = arith.mulf %23, %22 : vector<2x64xf32>
    %cst_13 = arith.constant 5.000000e-01 : f32
    %25 = vector.broadcast %cst_13 : f32 to vector<2x64xf32>
    %26 = arith.addf %24, %25 : vector<2x64xf32>
    %27 = arith.mulf %20, %6 : vector<2x64xf32>
    %28 = arith.mulf %15, %21 : vector<2x64xf32>
    %29 = arith.addf %27, %28 : vector<2x64xf32>
    %30 = math.tanh %29 : vector<2x64xf32>
    %31 = arith.mulf %26, %30 : vector<2x64xf32>
    %32 = vector.extract_strided_slice %31 {offsets = [0, 0], sizes = [2, 32], strides = [1, 1]} : vector<2x64xf32> to vector<2x32xf32>
    %c0_14 = arith.constant 0 : index
    %c0_15 = arith.constant 0 : index
    %33 = vector.load %arg3[%c0_14, %c0_15] : memref<16x64xf32, #tpu.memory_space<vmem>>, vector<2x32xf32>
    tpu.vector_store %arg3[%c0_14, %c0_15], %32 {strides = array<i32>} : memref<16x64xf32, #tpu.memory_space<vmem>>, vector<2x32xf32>,
    %34 = vector.extract_strided_slice %31 {offsets = [0, 32], sizes = [2, 32], strides = [1, 1]} : vector<2x64xf32> to vector<2x32xf32>
    %c14 = arith.constant 14 : index
    %c32_16 = arith.constant 32 : index
    %35 = vector.load %arg3[%c14, %c32_16] : memref<16x64xf32, #tpu.memory_space<vmem>>, vector<2x32xf32>
    tpu.vector_store %arg3[%c14, %c32_16], %34 {strides = array<i32>} : memref<16x64xf32, #tpu.memory_space<vmem>>, vector<2x32xf32>,
    %36 = vector.extract_strided_slice %4 {offsets = [2, 0], sizes = [2, 256], strides = [1, 1]} : vector<16x256xf32> to vector<2x256xf32>
    %cst_17 = arith.constant dense<0.000000e+00> : vector<2x256xf32>
    %37 = tpu.matmul %31, %1, %cst_17 {dimension_numbers = #tpu.dot_dimension_numbers<[1], [0], [0], [1], [0, 0, 1, 1], [], []>} : vector<2x64xf32>, vector<64x256xf32>, vector<2x256xf32> -> vector<2x256xf32>
    %38 = arith.addf %36, %37 : vector<2x256xf32>
    %39 = math.tanh %38 : vector<2x256xf32>
    %40 = vector.extract_strided_slice %39 {offsets = [0, 0], sizes = [2, 64], strides = [1, 1]} : vector<2x256xf32> to vector<2x64xf32>
    %cst_18 = arith.constant 5.000000e-01 : f32
    %41 = vector.broadcast %cst_18 : f32 to vector<2x64xf32>
    %42 = arith.mulf %41, %40 : vector<2x64xf32>
    %cst_19 = arith.constant 5.000000e-01 : f32
    %43 = vector.broadcast %cst_19 : f32 to vector<2x64xf32>
    %44 = arith.addf %42, %43 : vector<2x64xf32>
    %45 = vector.extract_strided_slice %39 {offsets = [0, 64], sizes = [2, 64], strides = [1, 1]} : vector<2x256xf32> to vector<2x64xf32>
    %cst_20 = arith.constant 5.000000e-01 : f32
    %46 = vector.broadcast %cst_20 : f32 to vector<2x64xf32>
    %47 = arith.mulf %46, %45 : vector<2x64xf32>
    %cst_21 = arith.constant 5.000000e-01 : f32
    %48 = vector.broadcast %cst_21 : f32 to vector<2x64xf32>
    %49 = arith.addf %47, %48 : vector<2x64xf32>
    %50 = vector.extract_strided_slice %39 {offsets = [0, 128], sizes = [2, 64], strides = [1, 1]} : vector<2x256xf32> to vector<2x64xf32>
    %51 = vector.extract_strided_slice %39 {offsets = [0, 192], sizes = [2, 64], strides = [1, 1]} : vector<2x256xf32> to vector<2x64xf32>
    %cst_22 = arith.constant 5.000000e-01 : f32
    %52 = vector.broadcast %cst_22 : f32 to vector<2x64xf32>
    %53 = arith.mulf %52, %51 : vector<2x64xf32>
    %cst_23 = arith.constant 5.000000e-01 : f32
    %54 = vector.broadcast %cst_23 : f32 to vector<2x64xf32>
    %55 = arith.addf %53, %54 : vector<2x64xf32>
    %56 = arith.mulf %49, %29 : vector<2x64xf32>
    %57 = arith.mulf %44, %50 : vector<2x64xf32>
    %58 = arith.addf %56, %57 : vector<2x64xf32>
    %59 = math.tanh %58 : vector<2x64xf32>
    %60 = arith.mulf %55, %59 : vector<2x64xf32>
    %61 = vector.extract_strided_slice %60 {offsets = [0, 0], sizes = [2, 32], strides = [1, 1]} : vector<2x64xf32> to vector<2x32xf32>
    %c2 = arith.constant 2 : index
    %c0_24 = arith.constant 0 : index
    %62 = vector.load %arg3[%c2, %c0_24] : memref<16x64xf32, #tpu.memory_space<vmem>>, vector<2x32xf32>
    tpu.vector_store %arg3[%c2, %c0_24], %61 {strides = array<i32>} : memref<16x64xf32, #tpu.memory_space<vmem>>, vector<2x32xf32>,
    %63 = vector.extract_strided_slice %60 {offsets = [0, 32], sizes = [2, 32], strides = [1, 1]} : vector<2x64xf32> to vector<2x32xf32>
    %c12 = arith.constant 12 : index
    %c32_25 = arith.constant 32 : index
    %64 = vector.load %arg3[%c12, %c32_25] : memref<16x64xf32, #tpu.memory_space<vmem>>, vector<2x32xf32>
    tpu.vector_store %arg3[%c12, %c32_25], %63 {strides = array<i32>} : memref<16x64xf32, #tpu.memory_space<vmem>>, vector<2x32xf32>,
    %65 = vector.extract_strided_slice %4 {offsets = [4, 0], sizes = [2, 256], strides = [1, 1]} : vector<16x256xf32> to vector<2x256xf32>
    %cst_26 = arith.constant dense<0.000000e+00> : vector<2x256xf32>
    %66 = tpu.matmul %60, %1, %cst_26 {dimension_numbers = #tpu.dot_dimension_numbers<[1], [0], [0], [1], [0, 0, 1, 1], [], []>} : vector<2x64xf32>, vector<64x256xf32>, vector<2x256xf32> -> vector<2x256xf32>
    %67 = arith.addf %65, %66 : vector<2x256xf32>
    %68 = math.tanh %67 : vector<2x256xf32>
    %69 = vector.extract_strided_slice %68 {offsets = [0, 0], sizes = [2, 64], strides = [1, 1]} : vector<2x256xf32> to vector<2x64xf32>
    %cst_27 = arith.constant 5.000000e-01 : f32
    %70 = vector.broadcast %cst_27 : f32 to vector<2x64xf32>
    %71 = arith.mulf %70, %69 : vector<2x64xf32>
    %cst_28 = arith.constant 5.000000e-01 : f32
    %72 = vector.broadcast %cst_28 : f32 to vector<2x64xf32>
    %73 = arith.addf %71, %72 : vector<2x64xf32>
    %74 = vector.extract_strided_slice %68 {offsets = [0, 64], sizes = [2, 64], strides = [1, 1]} : vector<2x256xf32> to vector<2x64xf32>
    %cst_29 = arith.constant 5.000000e-01 : f32
    %75 = vector.broadcast %cst_29 : f32 to vector<2x64xf32>
    %76 = arith.mulf %75, %74 : vector<2x64xf32>
    %cst_30 = arith.constant 5.000000e-01 : f32
    %77 = vector.broadcast %cst_30 : f32 to vector<2x64xf32>
    %78 = arith.addf %76, %77 : vector<2x64xf32>
    %79 = vector.extract_strided_slice %68 {offsets = [0, 128], sizes = [2, 64], strides = [1, 1]} : vector<2x256xf32> to vector<2x64xf32>
    %80 = vector.extract_strided_slice %68 {offsets = [0, 192], sizes = [2, 64], strides = [1, 1]} : vector<2x256xf32> to vector<2x64xf32>
    %cst_31 = arith.constant 5.000000e-01 : f32
    %81 = vector.broadcast %cst_31 : f32 to vector<2x64xf32>
    %82 = arith.mulf %81, %80 : vector<2x64xf32>
    %cst_32 = arith.constant 5.000000e-01 : f32
    %83 = vector.broadcast %cst_32 : f32 to vector<2x64xf32>
    %84 = arith.addf %82, %83 : vector<2x64xf32>
    %85 = arith.mulf %78, %58 : vector<2x64xf32>
    %86 = arith.mulf %73, %79 : vector<2x64xf32>
    %87 = arith.addf %85, %86 : vector<2x64xf32>
    %88 = math.tanh %87 : vector<2x64xf32>
    %89 = arith.mulf %84, %88 : vector<2x64xf32>
    %90 = vector.extract_strided_slice %89 {offsets = [0, 0], sizes = [2, 32], strides = [1, 1]} : vector<2x64xf32> to vector<2x32xf32>
    %c4 = arith.constant 4 : index
    %c0_33 = arith.constant 0 : index
    %91 = vector.load %arg3[%c4, %c0_33] : memref<16x64xf32, #tpu.memory_space<vmem>>, vector<2x32xf32>
    tpu.vector_store %arg3[%c4, %c0_33], %90 {strides = array<i32>} : memref<16x64xf32, #tpu.memory_space<vmem>>, vector<2x32xf32>,
    %92 = vector.extract_strided_slice %89 {offsets = [0, 32], sizes = [2, 32], strides = [1, 1]} : vector<2x64xf32> to vector<2x32xf32>
    %c10 = arith.constant 10 : index
    %c32_34 = arith.constant 32 : index
    %93 = vector.load %arg3[%c10, %c32_34] : memref<16x64xf32, #tpu.memory_space<vmem>>, vector<2x32xf32>
    tpu.vector_store %arg3[%c10, %c32_34], %92 {strides = array<i32>} : memref<16x64xf32, #tpu.memory_space<vmem>>, vector<2x32xf32>,
    %94 = vector.extract_strided_slice %4 {offsets = [6, 0], sizes = [2, 256], strides = [1, 1]} : vector<16x256xf32> to vector<2x256xf32>
    %cst_35 = arith.constant dense<0.000000e+00> : vector<2x256xf32>
    %95 = tpu.matmul %89, %1, %cst_35 {dimension_numbers = #tpu.dot_dimension_numbers<[1], [0], [0], [1], [0, 0, 1, 1], [], []>} : vector<2x64xf32>, vector<64x256xf32>, vector<2x256xf32> -> vector<2x256xf32>
    %96 = arith.addf %94, %95 : vector<2x256xf32>
    %97 = math.tanh %96 : vector<2x256xf32>
    %98 = vector.extract_strided_slice %97 {offsets = [0, 0], sizes = [2, 64], strides = [1, 1]} : vector<2x256xf32> to vector<2x64xf32>
    %cst_36 = arith.constant 5.000000e-01 : f32
    %99 = vector.broadcast %cst_36 : f32 to vector<2x64xf32>
    %100 = arith.mulf %99, %98 : vector<2x64xf32>
    %cst_37 = arith.constant 5.000000e-01 : f32
    %101 = vector.broadcast %cst_37 : f32 to vector<2x64xf32>
    %102 = arith.addf %100, %101 : vector<2x64xf32>
    %103 = vector.extract_strided_slice %97 {offsets = [0, 64], sizes = [2, 64], strides = [1, 1]} : vector<2x256xf32> to vector<2x64xf32>
    %cst_38 = arith.constant 5.000000e-01 : f32
    %104 = vector.broadcast %cst_38 : f32 to vector<2x64xf32>
    %105 = arith.mulf %104, %103 : vector<2x64xf32>
    %cst_39 = arith.constant 5.000000e-01 : f32
    %106 = vector.broadcast %cst_39 : f32 to vector<2x64xf32>
    %107 = arith.addf %105, %106 : vector<2x64xf32>
    %108 = vector.extract_strided_slice %97 {offsets = [0, 128], sizes = [2, 64], strides = [1, 1]} : vector<2x256xf32> to vector<2x64xf32>
    %109 = vector.extract_strided_slice %97 {offsets = [0, 192], sizes = [2, 64], strides = [1, 1]} : vector<2x256xf32> to vector<2x64xf32>
    %cst_40 = arith.constant 5.000000e-01 : f32
    %110 = vector.broadcast %cst_40 : f32 to vector<2x64xf32>
    %111 = arith.mulf %110, %109 : vector<2x64xf32>
    %cst_41 = arith.constant 5.000000e-01 : f32
    %112 = vector.broadcast %cst_41 : f32 to vector<2x64xf32>
    %113 = arith.addf %111, %112 : vector<2x64xf32>
    %114 = arith.mulf %107, %87 : vector<2x64xf32>
    %115 = arith.mulf %102, %108 : vector<2x64xf32>
    %116 = arith.addf %114, %115 : vector<2x64xf32>
    %117 = math.tanh %116 : vector<2x64xf32>
    %118 = arith.mulf %113, %117 : vector<2x64xf32>
    %119 = vector.extract_strided_slice %118 {offsets = [0, 0], sizes = [2, 32], strides = [1, 1]} : vector<2x64xf32> to vector<2x32xf32>
    %c6 = arith.constant 6 : index
    %c0_42 = arith.constant 0 : index
    %120 = vector.load %arg3[%c6, %c0_42] : memref<16x64xf32, #tpu.memory_space<vmem>>, vector<2x32xf32>
    tpu.vector_store %arg3[%c6, %c0_42], %119 {strides = array<i32>} : memref<16x64xf32, #tpu.memory_space<vmem>>, vector<2x32xf32>,
    %121 = vector.extract_strided_slice %118 {offsets = [0, 32], sizes = [2, 32], strides = [1, 1]} : vector<2x64xf32> to vector<2x32xf32>
    %c8 = arith.constant 8 : index
    %c32_43 = arith.constant 32 : index
    %122 = vector.load %arg3[%c8, %c32_43] : memref<16x64xf32, #tpu.memory_space<vmem>>, vector<2x32xf32>
    tpu.vector_store %arg3[%c8, %c32_43], %121 {strides = array<i32>} : memref<16x64xf32, #tpu.memory_space<vmem>>, vector<2x32xf32>,
    %123 = vector.extract_strided_slice %4 {offsets = [8, 0], sizes = [2, 256], strides = [1, 1]} : vector<16x256xf32> to vector<2x256xf32>
    %cst_44 = arith.constant dense<0.000000e+00> : vector<2x256xf32>
    %124 = tpu.matmul %118, %1, %cst_44 {dimension_numbers = #tpu.dot_dimension_numbers<[1], [0], [0], [1], [0, 0, 1, 1], [], []>} : vector<2x64xf32>, vector<64x256xf32>, vector<2x256xf32> -> vector<2x256xf32>
    %125 = arith.addf %123, %124 : vector<2x256xf32>
    %126 = math.tanh %125 : vector<2x256xf32>
    %127 = vector.extract_strided_slice %126 {offsets = [0, 0], sizes = [2, 64], strides = [1, 1]} : vector<2x256xf32> to vector<2x64xf32>
    %cst_45 = arith.constant 5.000000e-01 : f32
    %128 = vector.broadcast %cst_45 : f32 to vector<2x64xf32>
    %129 = arith.mulf %128, %127 : vector<2x64xf32>
    %cst_46 = arith.constant 5.000000e-01 : f32
    %130 = vector.broadcast %cst_46 : f32 to vector<2x64xf32>
    %131 = arith.addf %129, %130 : vector<2x64xf32>
    %132 = vector.extract_strided_slice %126 {offsets = [0, 64], sizes = [2, 64], strides = [1, 1]} : vector<2x256xf32> to vector<2x64xf32>
    %cst_47 = arith.constant 5.000000e-01 : f32
    %133 = vector.broadcast %cst_47 : f32 to vector<2x64xf32>
    %134 = arith.mulf %133, %132 : vector<2x64xf32>
    %cst_48 = arith.constant 5.000000e-01 : f32
    %135 = vector.broadcast %cst_48 : f32 to vector<2x64xf32>
    %136 = arith.addf %134, %135 : vector<2x64xf32>
    %137 = vector.extract_strided_slice %126 {offsets = [0, 128], sizes = [2, 64], strides = [1, 1]} : vector<2x256xf32> to vector<2x64xf32>
    %138 = vector.extract_strided_slice %126 {offsets = [0, 192], sizes = [2, 64], strides = [1, 1]} : vector<2x256xf32> to vector<2x64xf32>
    %cst_49 = arith.constant 5.000000e-01 : f32
    %139 = vector.broadcast %cst_49 : f32 to vector<2x64xf32>
    %140 = arith.mulf %139, %138 : vector<2x64xf32>
    %cst_50 = arith.constant 5.000000e-01 : f32
    %141 = vector.broadcast %cst_50 : f32 to vector<2x64xf32>
    %142 = arith.addf %140, %141 : vector<2x64xf32>
    %143 = arith.mulf %136, %116 : vector<2x64xf32>
    %144 = arith.mulf %131, %137 : vector<2x64xf32>
    %145 = arith.addf %143, %144 : vector<2x64xf32>
    %146 = math.tanh %145 : vector<2x64xf32>
    %147 = arith.mulf %142, %146 : vector<2x64xf32>
    %148 = vector.extract_strided_slice %147 {offsets = [0, 0], sizes = [2, 32], strides = [1, 1]} : vector<2x64xf32> to vector<2x32xf32>
    %c8_51 = arith.constant 8 : index
    %c0_52 = arith.constant 0 : index
    %149 = vector.load %arg3[%c8_51, %c0_52] : memref<16x64xf32, #tpu.memory_space<vmem>>, vector<2x32xf32>
    tpu.vector_store %arg3[%c8_51, %c0_52], %148 {strides = array<i32>} : memref<16x64xf32, #tpu.memory_space<vmem>>, vector<2x32xf32>,
    %150 = vector.extract_strided_slice %147 {offsets = [0, 32], sizes = [2, 32], strides = [1, 1]} : vector<2x64xf32> to vector<2x32xf32>
    %c6_53 = arith.constant 6 : index
    %c32_54 = arith.constant 32 : index
    %151 = vector.load %arg3[%c6_53, %c32_54] : memref<16x64xf32, #tpu.memory_space<vmem>>, vector<2x32xf32>
    tpu.vector_store %arg3[%c6_53, %c32_54], %150 {strides = array<i32>} : memref<16x64xf32, #tpu.memory_space<vmem>>, vector<2x32xf32>,
    %152 = vector.extract_strided_slice %4 {offsets = [10, 0], sizes = [2, 256], strides = [1, 1]} : vector<16x256xf32> to vector<2x256xf32>
    %cst_55 = arith.constant dense<0.000000e+00> : vector<2x256xf32>
    %153 = tpu.matmul %147, %1, %cst_55 {dimension_numbers = #tpu.dot_dimension_numbers<[1], [0], [0], [1], [0, 0, 1, 1], [], []>} : vector<2x64xf32>, vector<64x256xf32>, vector<2x256xf32> -> vector<2x256xf32>
    %154 = arith.addf %152, %153 : vector<2x256xf32>
    %155 = math.tanh %154 : vector<2x256xf32>
    %156 = vector.extract_strided_slice %155 {offsets = [0, 0], sizes = [2, 64], strides = [1, 1]} : vector<2x256xf32> to vector<2x64xf32>
    %cst_56 = arith.constant 5.000000e-01 : f32
    %157 = vector.broadcast %cst_56 : f32 to vector<2x64xf32>
    %158 = arith.mulf %157, %156 : vector<2x64xf32>
    %cst_57 = arith.constant 5.000000e-01 : f32
    %159 = vector.broadcast %cst_57 : f32 to vector<2x64xf32>
    %160 = arith.addf %158, %159 : vector<2x64xf32>
    %161 = vector.extract_strided_slice %155 {offsets = [0, 64], sizes = [2, 64], strides = [1, 1]} : vector<2x256xf32> to vector<2x64xf32>
    %cst_58 = arith.constant 5.000000e-01 : f32
    %162 = vector.broadcast %cst_58 : f32 to vector<2x64xf32>
    %163 = arith.mulf %162, %161 : vector<2x64xf32>
    %cst_59 = arith.constant 5.000000e-01 : f32
    %164 = vector.broadcast %cst_59 : f32 to vector<2x64xf32>
    %165 = arith.addf %163, %164 : vector<2x64xf32>
    %166 = vector.extract_strided_slice %155 {offsets = [0, 128], sizes = [2, 64], strides = [1, 1]} : vector<2x256xf32> to vector<2x64xf32>
    %167 = vector.extract_strided_slice %155 {offsets = [0, 192], sizes = [2, 64], strides = [1, 1]} : vector<2x256xf32> to vector<2x64xf32>
    %cst_60 = arith.constant 5.000000e-01 : f32
    %168 = vector.broadcast %cst_60 : f32 to vector<2x64xf32>
    %169 = arith.mulf %168, %167 : vector<2x64xf32>
    %cst_61 = arith.constant 5.000000e-01 : f32
    %170 = vector.broadcast %cst_61 : f32 to vector<2x64xf32>
    %171 = arith.addf %169, %170 : vector<2x64xf32>
    %172 = arith.mulf %165, %145 : vector<2x64xf32>
    %173 = arith.mulf %160, %166 : vector<2x64xf32>
    %174 = arith.addf %172, %173 : vector<2x64xf32>
    %175 = math.tanh %174 : vector<2x64xf32>
    %176 = arith.mulf %171, %175 : vector<2x64xf32>
    %177 = vector.extract_strided_slice %176 {offsets = [0, 0], sizes = [2, 32], strides = [1, 1]} : vector<2x64xf32> to vector<2x32xf32>
    %c10_62 = arith.constant 10 : index
    %c0_63 = arith.constant 0 : index
    %178 = vector.load %arg3[%c10_62, %c0_63] : memref<16x64xf32, #tpu.memory_space<vmem>>, vector<2x32xf32>
    tpu.vector_store %arg3[%c10_62, %c0_63], %177 {strides = array<i32>} : memref<16x64xf32, #tpu.memory_space<vmem>>, vector<2x32xf32>,
    %179 = vector.extract_strided_slice %176 {offsets = [0, 32], sizes = [2, 32], strides = [1, 1]} : vector<2x64xf32> to vector<2x32xf32>
    %c4_64 = arith.constant 4 : index
    %c32_65 = arith.constant 32 : index
    %180 = vector.load %arg3[%c4_64, %c32_65] : memref<16x64xf32, #tpu.memory_space<vmem>>, vector<2x32xf32>
    tpu.vector_store %arg3[%c4_64, %c32_65], %179 {strides = array<i32>} : memref<16x64xf32, #tpu.memory_space<vmem>>, vector<2x32xf32>,
    %181 = vector.extract_strided_slice %4 {offsets = [12, 0], sizes = [2, 256], strides = [1, 1]} : vector<16x256xf32> to vector<2x256xf32>
    %cst_66 = arith.constant dense<0.000000e+00> : vector<2x256xf32>
    %182 = tpu.matmul %176, %1, %cst_66 {dimension_numbers = #tpu.dot_dimension_numbers<[1], [0], [0], [1], [0, 0, 1, 1], [], []>} : vector<2x64xf32>, vector<64x256xf32>, vector<2x256xf32> -> vector<2x256xf32>
    %183 = arith.addf %181, %182 : vector<2x256xf32>
    %184 = math.tanh %183 : vector<2x256xf32>
    %185 = vector.extract_strided_slice %184 {offsets = [0, 0], sizes = [2, 64], strides = [1, 1]} : vector<2x256xf32> to vector<2x64xf32>
    %cst_67 = arith.constant 5.000000e-01 : f32
    %186 = vector.broadcast %cst_67 : f32 to vector<2x64xf32>
    %187 = arith.mulf %186, %185 : vector<2x64xf32>
    %cst_68 = arith.constant 5.000000e-01 : f32
    %188 = vector.broadcast %cst_68 : f32 to vector<2x64xf32>
    %189 = arith.addf %187, %188 : vector<2x64xf32>
    %190 = vector.extract_strided_slice %184 {offsets = [0, 64], sizes = [2, 64], strides = [1, 1]} : vector<2x256xf32> to vector<2x64xf32>
    %cst_69 = arith.constant 5.000000e-01 : f32
    %191 = vector.broadcast %cst_69 : f32 to vector<2x64xf32>
    %192 = arith.mulf %191, %190 : vector<2x64xf32>
    %cst_70 = arith.constant 5.000000e-01 : f32
    %193 = vector.broadcast %cst_70 : f32 to vector<2x64xf32>
    %194 = arith.addf %192, %193 : vector<2x64xf32>
    %195 = vector.extract_strided_slice %184 {offsets = [0, 128], sizes = [2, 64], strides = [1, 1]} : vector<2x256xf32> to vector<2x64xf32>
    %196 = vector.extract_strided_slice %184 {offsets = [0, 192], sizes = [2, 64], strides = [1, 1]} : vector<2x256xf32> to vector<2x64xf32>
    %cst_71 = arith.constant 5.000000e-01 : f32
    %197 = vector.broadcast %cst_71 : f32 to vector<2x64xf32>
    %198 = arith.mulf %197, %196 : vector<2x64xf32>
    %cst_72 = arith.constant 5.000000e-01 : f32
    %199 = vector.broadcast %cst_72 : f32 to vector<2x64xf32>
    %200 = arith.addf %198, %199 : vector<2x64xf32>
    %201 = arith.mulf %194, %174 : vector<2x64xf32>
    %202 = arith.mulf %189, %195 : vector<2x64xf32>
    %203 = arith.addf %201, %202 : vector<2x64xf32>
    %204 = math.tanh %203 : vector<2x64xf32>
    %205 = arith.mulf %200, %204 : vector<2x64xf32>
    %206 = vector.extract_strided_slice %205 {offsets = [0, 0], sizes = [2, 32], strides = [1, 1]} : vector<2x64xf32> to vector<2x32xf32>
    %c12_73 = arith.constant 12 : index
    %c0_74 = arith.constant 0 : index
    %207 = vector.load %arg3[%c12_73, %c0_74] : memref<16x64xf32, #tpu.memory_space<vmem>>, vector<2x32xf32>
    tpu.vector_store %arg3[%c12_73, %c0_74], %206 {strides = array<i32>} : memref<16x64xf32, #tpu.memory_space<vmem>>, vector<2x32xf32>,
    %208 = vector.extract_strided_slice %205 {offsets = [0, 32], sizes = [2, 32], strides = [1, 1]} : vector<2x64xf32> to vector<2x32xf32>
    %c2_75 = arith.constant 2 : index
    %c32_76 = arith.constant 32 : index
    %209 = vector.load %arg3[%c2_75, %c32_76] : memref<16x64xf32, #tpu.memory_space<vmem>>, vector<2x32xf32>
    tpu.vector_store %arg3[%c2_75, %c32_76], %208 {strides = array<i32>} : memref<16x64xf32, #tpu.memory_space<vmem>>, vector<2x32xf32>,
    %210 = vector.extract_strided_slice %4 {offsets = [14, 0], sizes = [2, 256], strides = [1, 1]} : vector<16x256xf32> to vector<2x256xf32>
    %cst_77 = arith.constant dense<0.000000e+00> : vector<2x256xf32>
    %211 = tpu.matmul %205, %1, %cst_77 {dimension_numbers = #tpu.dot_dimension_numbers<[1], [0], [0], [1], [0, 0, 1, 1], [], []>} : vector<2x64xf32>, vector<64x256xf32>, vector<2x256xf32> -> vector<2x256xf32>
    %212 = arith.addf %210, %211 : vector<2x256xf32>
    %213 = math.tanh %212 : vector<2x256xf32>
    %214 = vector.extract_strided_slice %213 {offsets = [0, 0], sizes = [2, 64], strides = [1, 1]} : vector<2x256xf32> to vector<2x64xf32>
    %cst_78 = arith.constant 5.000000e-01 : f32
    %215 = vector.broadcast %cst_78 : f32 to vector<2x64xf32>
    %216 = arith.mulf %215, %214 : vector<2x64xf32>
    %cst_79 = arith.constant 5.000000e-01 : f32
    %217 = vector.broadcast %cst_79 : f32 to vector<2x64xf32>
    %218 = arith.addf %216, %217 : vector<2x64xf32>
    %219 = vector.extract_strided_slice %213 {offsets = [0, 64], sizes = [2, 64], strides = [1, 1]} : vector<2x256xf32> to vector<2x64xf32>
    %cst_80 = arith.constant 5.000000e-01 : f32
    %220 = vector.broadcast %cst_80 : f32 to vector<2x64xf32>
    %221 = arith.mulf %220, %219 : vector<2x64xf32>
    %cst_81 = arith.constant 5.000000e-01 : f32
    %222 = vector.broadcast %cst_81 : f32 to vector<2x64xf32>
    %223 = arith.addf %221, %222 : vector<2x64xf32>
    %224 = vector.extract_strided_slice %213 {offsets = [0, 128], sizes = [2, 64], strides = [1, 1]} : vector<2x256xf32> to vector<2x64xf32>
    %225 = vector.extract_strided_slice %213 {offsets = [0, 192], sizes = [2, 64], strides = [1, 1]} : vector<2x256xf32> to vector<2x64xf32>
    %cst_82 = arith.constant 5.000000e-01 : f32
    %226 = vector.broadcast %cst_82 : f32 to vector<2x64xf32>
    %227 = arith.mulf %226, %225 : vector<2x64xf32>
    %cst_83 = arith.constant 5.000000e-01 : f32
    %228 = vector.broadcast %cst_83 : f32 to vector<2x64xf32>
    %229 = arith.addf %227, %228 : vector<2x64xf32>
    %230 = arith.mulf %223, %203 : vector<2x64xf32>
    %231 = arith.mulf %218, %224 : vector<2x64xf32>
    %232 = arith.addf %230, %231 : vector<2x64xf32>
    %233 = math.tanh %232 : vector<2x64xf32>
    %234 = arith.mulf %229, %233 : vector<2x64xf32>
    %235 = vector.extract_strided_slice %234 {offsets = [0, 0], sizes = [2, 32], strides = [1, 1]} : vector<2x64xf32> to vector<2x32xf32>
    %c14_84 = arith.constant 14 : index
    %c0_85 = arith.constant 0 : index
    %236 = vector.load %arg3[%c14_84, %c0_85] : memref<16x64xf32, #tpu.memory_space<vmem>>, vector<2x32xf32>
    tpu.vector_store %arg3[%c14_84, %c0_85], %235 {strides = array<i32>} : memref<16x64xf32, #tpu.memory_space<vmem>>, vector<2x32xf32>,
    %237 = vector.extract_strided_slice %234 {offsets = [0, 32], sizes = [2, 32], strides = [1, 1]} : vector<2x64xf32> to vector<2x32xf32>
    %c0_86 = arith.constant 0 : index
    %c32_87 = arith.constant 32 : index
    %238 = vector.load %arg3[%c0_86, %c32_87] : memref<16x64xf32, #tpu.memory_space<vmem>>, vector<2x32xf32>
    tpu.vector_store %arg3[%c0_86, %c32_87], %237 {strides = array<i32>} : memref<16x64xf32, #tpu.memory_space<vmem>>, vector<2x32xf32>,
    %239 = vector.extract_strided_slice %2 {offsets = [0, 0], sizes = [1, 64], strides = [1, 1]} : vector<1x256xf32> to vector<1x64xf32>
    %240 = vector.extract_strided_slice %2 {offsets = [0, 64], sizes = [1, 1], strides = [1, 1]} : vector<1x256xf32> to vector<1x1xf32>
    %c0_88 = arith.constant 0 : index
    %c0_89 = arith.constant 0 : index
    %241 = vector.load %arg3[%c0_88, %c0_89] : memref<16x64xf32, #tpu.memory_space<vmem>>, vector<16x64xf32>
    %242 = vector.broadcast %239 : vector<1x64xf32> to vector<16x64xf32>
    %243 = arith.mulf %241, %242 : vector<16x64xf32>
    %cst_90 = arith.constant dense<0.000000e+00> : vector<16xf32>
    %244 = vector.multi_reduction <add>, %243, %cst_90 [1] : vector<16x64xf32> to vector<16xf32>
    %245 = vector.shape_cast %244 : vector<16xf32> to vector<16x1xf32>
    %246 = vector.broadcast %240 : vector<1x1xf32> to vector<16x1xf32>
    %247 = arith.addf %245, %246 : vector<16x1xf32>
    %c0_91 = arith.constant 0 : index
    %c0_92 = arith.constant 0 : index
    %248 = vector.load %arg2[%c0_91, %c0_92] : memref<16x1xf32, #tpu.memory_space<vmem>>, vector<16x1xf32>
    tpu.vector_store %arg2[%c0_91, %c0_92], %247 {strides = array<i32>} : memref<16x1xf32, #tpu.memory_space<vmem>>, vector<16x1xf32>,
    return
  }
}

</mosaic_0001>

<bundles_post_ra>
// kernel: tpu_custom_call.1
= control target key start
LH: loop header
LB: loop body
LE: loop exit
PB: predicated region body
PF: predicated region fallthrough
CT: control target
= control target key end

     0   :  { %7 = vsyncpa [#allocation4], 0  ;;  %s1524_s0 = inlined_call_operand.hbm [shape: f32[16,32], index: 0, kind: input, shape index: {}]   ;;  %s1525_s1 = inlined_call_operand.hbm [shape: f32[97,256], index: 1, kind: input, shape index: {}]   ;;  %s1526_s2 = inlined_call_operand.vmem [shape: f32[16,1], index: 2, kind: output, shape index: {}]  }
   0x1   :  { %8 = vsyncpa [#allocation6], 0  ;;  %s1285_s9 = smov [#allocation3]   ;;  %s1237_s13 = scalar_lea.hbm %s1524_s0, 256 }
   0x2   :  { %s14_s10 = sshll.u32 %s1285_s9, 4  ;;  %p1238_p0 = scmp.ne.s32.totalorder %s1524_s0, %s1237_s13  ;;  %s15_s10 = int_to_ptr.vmem [resolvable:$true] %s14_s10 }
   0x3   :  { %p1241_p1 = scmp.lt.u32.totalorder %s1237_s13, %s1524_s0 }
   0x5   :  { %p1243_p2 = pnand %p1241_p1, %p1238_p0 }
   0x7   :  { %1246 = shalt.err (!%p1243_p2)
}
   0x8   :  { %s1247_s18 = scalar_lea.vmem %s15_s10, 256  ;;  %p1252_p4 = scmp.lt.s32.totalorder %s15_s10, %s15_s10 }
   0x9   :  { %p1248_p3 = scmp.ne.s32.totalorder %s15_s10, %s1247_s18  ;;  %p1253_p5 = scmp.lt.s32.totalorder %s1247_s18, %s1247_s18 }
   0xb   :  { %p1254_p6 = por %p1253_p5, %p1252_p4 }
   0xd   :  { %p1255_p7 = pnand %p1254_p6, %p1248_p3 }
   0xf   :  { %1258 = shalt.err (!%p1255_p7)
}
  0x10   :  { %s1286_s19 = smov 128   ;;  %s1287_s20 = smov 8  }
  0x11   :  { %20 = dma.hbm_to_vmem [thread:$0]  %s1524_s0, 256, %s15_s10, [#allocation4], %s1286_s19, %s1286_s19, %s1287_s20  }
  0x12   :  { %s1288_s23 = smov [#allocation5]   ;;  %s1259_s27 = scalar_lea.hbm %s1525_s1, 3328 }
  0x13   :  { %s26_s24 = sshll.u32 %s1288_s23, 4  ;;  %p1260_p8 = scmp.ne.s32.totalorder %s1525_s1, %s1259_s27  ;;  %s27_s24 = int_to_ptr.vmem [resolvable:$true] %s26_s24 }
  0x14   :  { %p1263_p9 = scmp.lt.u32.totalorder %s1259_s27, %s1525_s1 }
  0x16   :  { %p1265_p10 = pnand %p1263_p9, %p1260_p8 }
  0x18   :  { %1268 = shalt.err (!%p1265_p10)
}
  0x19   :  { %s1269_s4 = scalar_lea.vmem %s27_s24, 3328  ;;  %p1274_p12 = scmp.lt.s32.totalorder %s27_s24, %s27_s24 }
  0x1a   :  { %p1270_p11 = scmp.ne.s32.totalorder %s27_s24, %s1269_s4  ;;  %p1275_p13 = scmp.lt.s32.totalorder %s1269_s4, %s1269_s4 }
  0x1c   :  { %p1276_p0 = por %p1275_p13, %p1274_p12 }
  0x1e   :  { %p1277_p1 = pnand %p1276_p0, %p1270_p11 }
  0x20   :  { %1280 = shalt.err (!%p1277_p1)
}
  0x21   :  { %s1289_s0 = smov 256   ;;  %s1290_s5 = smov 16  }
  0x22   :  { %32 = dma.hbm_to_vmem [thread:$0]  %s1525_s1, 3328, %s27_s24, [#allocation6], %s1289_s0, %s1289_s0, %s1290_s5  }
  0x23   :  { %1281 = dma.done.wait [#allocation4], 256  }
  0x24   :  { %1282 = vsyncadd [#allocation4], 4294967040 }
  0x25   :  { %1283 = dma.done.wait [#allocation6], 3328  }
  0x26   :  { %1284 = vsyncadd [#allocation6], 4294963968  ;;  %v1291_v0 = vmov 0.0   ;;  %v48_v1 = vld [vmem:[#allocation5 + $0x48] sm:$0xff]  ;;  %v50_v2 = vld [vmem:[#allocation5 + $0x58] sm:$0xff]  ;;  %vm67_vm0 = vcmask 261120  }
  0x27   :  { %138 = vmatprep.mubr.f32.mxu0 %v1291_v0  ;;  %219 = vmatprep.mubr.f32.mxu1 %v1291_v0  ;;  %v47_v3 = vld [vmem:[#allocation5 + $0x40] sm:$0xff]  ;;  %v1334_v4 = vpack.c.bf16 %v50_v2, %v48_v1  ;;  %v49_v5 = vld [vmem:[#allocation5 + $0x50] sm:$0xff]  ;;  %v52_v6 = vld [vmem:[#allocation5 + $0x68] sm:$0xff]  ;;  %s1292_s1 = smov 64   ;;  %vm247_vm1 = vcmask 254976   ;;  %vm249_vm2 = vcmask 517376  }
  0x28   :  { %v54_v7 = vld [vmem:[#allocation5 + $0x78] sm:$0xff]  ;;  %v1336_v8 = vpack.c.bf16 %v49_v5, %v47_v3  ;;  %v51_v10 = vld [vmem:[#allocation5 + $0x60] sm:$0xff]  ;;  %v53_v11 = vld [vmem:[#allocation5 + $0x70] sm:$0xff]  ;;  %vm151_vm3 = vcmask 523264   ;;  %vm354_vm4 = vcmask 257026   ;;  %vm356_vm5 = vcmask 519426  }
  0x29   :  { %v1338_v9 = vpack.c.bf16 %v54_v7, %v52_v6  ;;  %v40_v12 = vld [vmem:[#allocation5 + $0x8] sm:$0xff]  ;;  %1054 = vmatprep.subr.bf16.mxu1 %v1334_v4  ;;  %v42_v13 = vld [vmem:[#allocation5 + $0x18] sm:$0xff]  ;;  %v39_v14 = vld [vmem:[#allocation5] sm:$0xff]  ;;  %v1342_v16 = vpack.c.bf16 %v53_v11, %v51_v10  ;;  %vm574_vm6 = vcmask 261126   ;;  %vm576_vm7 = vcmask 523526  }
  0x2a   :  { %v41_v15 = vld [vmem:[#allocation5 + $0x10] sm:$0xff]  ;;  %1056 = vmatpush1.bf16.msra.mxu1 %v1336_v8  ;;  %v1045_v17 = vpack.c.bf16 %v42_v13, %v40_v12  ;;  %v56_v19 = vld [vmem:[#allocation5 + $0x88] sm:$0xff]  ;;  %v58_v20 = vld [vmem:[#allocation5 + $0x98] sm:$0xff]  ;;  %vm464_vm8 = vcmask 259076   ;;  %vm466_vm9 = vcmask 521476   ;;  %vm1027_vm10 = vcmask 7168  }
  0x2b   :  { %v1047_v18 = vpack.c.bf16 %v41_v15, %v39_v14  ;;  %v55_v21 = vld [vmem:[#allocation5 + $0x80] sm:$0xff]  ;;  %1058 = vmatprep.subr.bf16.mxu1 %v1338_v9  ;;  %v1345_v22 = vpack.c.bf16 %v58_v20, %v56_v19  ;;  %v57_v23 = vld [vmem:[#allocation5 + $0x90] sm:$0xff]  ;;  %v44_v24 = vld [vmem:[#allocation5 + $0x28] sm:$0xff] }
  0x2c   :  { %v46_v25 = vld [vmem:[#allocation5 + $0x38] sm:$0xff]  ;;  %1046 = vmatprep.subr.bf16.mxu0 %v1045_v17  ;;  %v43_v27 = vld [vmem:[#allocation5 + $0x20] sm:$0xff]  ;;  %v45_v28 = vld [vmem:[#allocation5 + $0x30] sm:$0xff]  ;;  %v1348_v32 = vpack.c.bf16 %v57_v23, %v55_v21 }
  0x2d   :  { %v1049_v26 = vpack.c.bf16 %v46_v25, %v44_v24  ;;  %v60_v29 = vld [vmem:[#allocation5 + $0xa8] sm:$0xff]  ;;  %1048 = vmatpush1.bf16.msra.mxu0 %v1047_v18  ;;  %v1051_v30 = vpack.c.bf16 %v45_v28, %v43_v27  ;;  %v62_v31 = vld [vmem:[#allocation5 + $0xb8] sm:$0xff]  ;;  %v59_v34 = vld [vmem:[#allocation5 + $0xa0] sm:$0xff] }
  0x2e   :  { %1060 = vmatpush1.bf16.msra.mxu1 %v1342_v16  ;;  %v1351_v33 = vpack.c.bf16 %v62_v31, %v60_v29  ;;  %v61_v35 = vld [vmem:[#allocation5 + $0xb0] sm:$0xff]  ;;  %v66_v49 = vld [vmem:[#allocation3 + $0x8] sm:$0xff] }
  0x2f   :  { %1050 = vmatprep.subr.bf16.mxu0 %v1049_v26  ;;  %1062 = vmatprep.subr.bf16.mxu1 %v1345_v22  ;;  %v65_v36 = vld [vmem:[#allocation3] sm:$0xff]  ;;  %v1354_v37 = vpack.c.bf16 %v61_v35, %v59_v34 }
  0x31   :  { %1052 = vmatpush1.bf16.msra.mxu0 %v1051_v30 }
  0x32   :  { %1064 = vmatpush1.bf16.msra.mxu1 %v1348_v32  ;;  %1070 = vmatprep.subr.bf16.mxu0 %v1334_v4 }
  0x33   :  { %1066 = vmatprep.subr.bf16.mxu1 %v1351_v33 }
  0x34   :  { %1036 = vmatmul.mubr.msk.f32.vlgmr.msra.gmra.mrb[0].mxu0 %vm67_vm0, %v65_v36 }
  0x35   :  { %1072 = vmatpush1.bf16.msra.mxu0 %v1336_v8  ;;  %144 = vmatprep.mubr.f32.mxu0 %v1291_v0 }
  0x36   :  { %1068 = vmatpush1.bf16.msra.mxu1 %v1354_v37  ;;  %1074 = vmatprep.subr.bf16.mxu0 %v1338_v9 }
  0x37   :  { %1086 = vmatprep.subr.bf16.mxu1 %v1334_v4 }
  0x38   :  { %1037 = vmatmul.mubr.msk.f32.gmra.mrb[2].mxu0 %vm67_vm0, %v66_v49 }
  0x39   :  { %220 = vmatmul.mubr.f32.vlgmr.msra.gmra.mrb[0].mxu1 %v1291_v0  ;;  %1076 = vmatpush1.bf16.msra.mxu0 %v1342_v16 }
  0x3a   :  { %1078 = vmatprep.subr.bf16.mxu0 %v1345_v22  ;;  %1088 = vmatpush1.bf16.msra.mxu1 %v1336_v8 }
  0x3b   :  { %1090 = vmatprep.subr.bf16.mxu1 %v1338_v9  ;;  %427 = vmatprep.mubr.f32.mxu1 %v1291_v0 }
  0x3c   :  { %317 = vmatprep.mubr.f32.mxu0 %v1291_v0 }
  0x3d   :  { %1080 = vmatpush1.bf16.msra.mxu0 %v1348_v32 }
  0x3e   :  { %1082 = vmatprep.subr.bf16.mxu0 %v1351_v33  ;;  %1092 = vmatpush1.bf16.msra.mxu1 %v1342_v16 }
  0x3f   :  { %1094 = vmatprep.subr.bf16.mxu1 %v1345_v22 }
  0x41   :  { %1084 = vmatpush1.bf16.msra.mxu0 %v1354_v37 }
  0x42   :  { %1096 = vmatpush1.bf16.msra.mxu1 %v1348_v32  ;;  %1102 = vmatprep.subr.bf16.mxu0 %v1334_v4 }
  0x43   :  { %1098 = vmatprep.subr.bf16.mxu1 %v1351_v33 }
  0x46   :  { %1100 = vmatpush1.bf16.msra.mxu1 %v1354_v37 }
  0x47   :  { %1118 = vmatprep.subr.bf16.mxu1 %v1334_v4 }
 0x107   :  { %v1380_v38 = vpop.f32.mrb[0].mxu0 }
 0x108   :  { %v1382_v39 = vpop.f32.mrb[1].mxu0 }
 0x10b   :  { %v1390_v57 = vpop.f32.mrb[2].mxu0 }
 0x10c   :  { %v221_v40 = vpop.f32.mrb[0].mxu1  ;;  %v1392_v58 = vpop.f32.mrb[3].mxu0 }
 0x10d   :  { %v226_v41 = vadd.f32 %v221_v40, %v1380_v38  ;;  %v223_v42 = vpop.f32.mrb[1].mxu1 }
 0x10e   :  { %v227_v43 = vadd.f32 %v223_v42, %v1382_v39 }
 0x10f   :  { %1189 = vtanh.f32 %v226_v41 }
 0x110   :  { %1191 = vtanh.f32 %v227_v43 }
 0x119   :  { %v1190_v44 = vpop.eup %1189 }
 0x11a   :  { %v230_v45 = vmul.f32 0.5, %v1190_v44  ;;  %v1192_v47 = vpop.eup %1191 }
 0x11b   :  { %v232_v53 = vmul.f32 0.5, %v1192_v47 }
 0x11c   :  { %v231_v46 = vadd.f32 0.5, %v230_v45 }
 0x11d   :  { %v233_v54 = vadd.f32 0.5, %v232_v53 }
 0x11e   :  { %v235_v48 = vmul.f32 %v1192_v47, %v231_v46  ;;  %v234_v50 = vmul.f32 0.0, %v231_v46 }
 0x120   :  { %237 = vrot.lane.b32.xlu0 %v235_v48, %s1292_s1 }
 0x192   :  { %v238_v51 = vpop.permute.xlu0 %237 }
 0x193   :  { %v240_v52 = vadd.f32 %v238_v51, %v234_v50 }
 0x195   :  { %1193 = vtanh.f32 %v240_v52  ;;  %v339_v6 = vrot.slane %v240_v52, 6 }
 0x19f   :  { %v1194_v55 = vpop.eup %1193 }
 0x1a0   :  { %v242_v56 = vmul.f32 %v1194_v55, %v233_v54 }
 0x1a2   :  { %244 = vrot.lane.b32.xlu0 %v242_v56, %s1292_s1 }
 0x214   :  { %v245_v59 = vpop.permute.xlu0 %244 }
 0x215   :  { %248 = vst.msk [vmem:[#allocation2] sm:$0x3] %vm247_vm1, %v245_v59  ;;  %1038 = vmatmul.mubr.msk.f32.vlgmr.msra.gmra.mrb[4].mxu0 %vm151_vm3, %v245_v59 }
 0x216   :  { %250 = vst.msk [vmem:[#allocation2 + $0xe] sm:$0x3] %vm249_vm2, %v245_v59  ;;  %1104 = vmatpush1.bf16.msra.mxu0 %v1336_v8  ;;  %537 = vmatprep.mubr.f32.mxu0 %v1291_v0 }
 0x217   :  { %1106 = vmatprep.subr.bf16.mxu0 %v1338_v9 }
 0x21a   :  { %1108 = vmatpush1.bf16.msra.mxu0 %v1342_v16 }
 0x21b   :  { %1110 = vmatprep.subr.bf16.mxu0 %v1345_v22 }
 0x21e   :  { %1112 = vmatpush1.bf16.msra.mxu0 %v1348_v32 }
 0x21f   :  { %1114 = vmatprep.subr.bf16.mxu0 %v1351_v33 }
 0x222   :  { %1116 = vmatpush1.bf16.msra.mxu0 %v1354_v37 }
 0x223   :  { %1134 = vmatprep.subr.bf16.mxu0 %v1334_v4 }
 0x2e8   :  { %v319_v60 = vpop.f32.mrb[4].mxu0 }
 0x2e9   :  { %v326_v61 = vrot.slane %v319_v60, 6  ;;  %v321_v62 = vpop.f32.mrb[5].mxu0 }
 0x2ea   :  { %v327_v63 = vrot.slane %v321_v62, 6 }
 0x2eb   :  { %v330_v1 = vadd.f32 %v326_v61, %v1380_v38 }
 0x2ec   :  { %v331_v2 = vadd.f32 %v327_v63, %v1382_v39 }
 0x2ed   :  { %1195 = vtanh.f32 %v330_v1 }
 0x2ee   :  { %1197 = vtanh.f32 %v331_v2 }
 0x2f7   :  { %v1196_v3 = vpop.eup %1195 }
 0x2f8   :  { %v334_v5 = vmul.f32 0.5, %v1196_v3  ;;  %v1198_v10 = vpop.eup %1197 }
 0x2f9   :  { %v336_v15 = vmul.f32 0.5, %v1198_v10 }
 0x2fa   :  { %v335_v7 = vadd.f32 0.5, %v334_v5 }
 0x2fb   :  { %v337_v17 = vadd.f32 0.5, %v336_v15 }
 0x2fc   :  { %v342_v11 = vmul.f32 %v1198_v10, %v335_v7  ;;  %v341_v12 = vmul.f32 %v339_v6, %v335_v7 }
 0x2fe   :  { %344 = vrot.lane.b32.xlu1 %v342_v11, %s1292_s1 }
 0x370   :  { %v345_v13 = vpop.permute.xlu1 %344 }
 0x371   :  { %v347_v14 = vadd.f32 %v345_v13, %v341_v12 }
 0x373   :  { %1199 = vtanh.f32 %v347_v14  ;;  %v449_v31 = vrot.slane %v347_v14, 6 }
 0x37d   :  { %v1200_v18 = vpop.eup %1199 }
 0x37e   :  { %v1409_v19 = vmul.f32 %v1200_v18, %v337_v17 }
 0x380   :  { %v358_v20 = vrot.slane %v1409_v19, 2 }
 0x382   :  { %359 = vrot.lane.b32.xlu1 %v358_v20, %s1292_s1 }
 0x3f4   :  { %v360_v21 = vpop.permute.xlu1 %359 }
 0x3f5   :  { %1039 = vmatmul.mubr.msk.f32.vlgmr.msra.gmra.mrb[2].mxu1 %vm151_vm3, %v360_v21 }
 0x3f6   :  { %1120 = vmatpush1.bf16.msra.mxu1 %v1336_v8  ;;  %647 = vmatprep.mubr.f32.mxu1 %v1291_v0 }
 0x3f7   :  { %1122 = vmatprep.subr.bf16.mxu1 %v1338_v9 }
 0x3fa   :  { %1124 = vmatpush1.bf16.msra.mxu1 %v1342_v16 }
 0x3fb   :  { %1126 = vmatprep.subr.bf16.mxu1 %v1345_v22 }
 0x3fe   :  { %1128 = vmatpush1.bf16.msra.mxu1 %v1348_v32 }
 0x3ff   :  { %1130 = vmatprep.subr.bf16.mxu1 %v1351_v33 }
 0x402   :  { %1132 = vmatpush1.bf16.msra.mxu1 %v1354_v37 }
 0x403   :  { %1150 = vmatprep.subr.bf16.mxu1 %v1334_v4 }
 0x4c8   :  { %v429_v23 = vpop.f32.mrb[2].mxu1 }
 0x4c9   :  { %v436_v24 = vrot.slane %v429_v23, 4  ;;  %v431_v25 = vpop.f32.mrb[3].mxu1 }
 0x4ca   :  { %v437_v26 = vrot.slane %v431_v25, 4 }
 0x4cb   :  { %v440_v27 = vadd.f32 %v436_v24, %v1380_v38 }
 0x4cc   :  { %v441_v28 = vadd.f32 %v437_v26, %v1382_v39 }
 0x4cd   :  { %1201 = vtanh.f32 %v440_v27 }
 0x4ce   :  { %1203 = vtanh.f32 %v441_v28 }
 0x4d7   :  { %v1202_v29 = vpop.eup %1201 }
 0x4d8   :  { %v444_v30 = vmul.f32 0.5, %v1202_v29  ;;  %v1204_v35 = vpop.eup %1203 }
 0x4d9   :  { %v446_v43 = vmul.f32 0.5, %v1204_v35 }
 0x4da   :  { %v445_v34 = vadd.f32 0.5, %v444_v30 }
 0x4db   :  { %v447_v44 = vadd.f32 0.5, %v446_v43 }
 0x4dc   :  { %v452_v36 = vmul.f32 %v1204_v35, %v445_v34  ;;  %v451_v40 = vmul.f32 %v449_v31, %v445_v34 }
 0x4de   :  { %454 = vrot.lane.b32.xlu0 %v452_v36, %s1292_s1 }
 0x550   :  { %v455_v41 = vpop.permute.xlu0 %454 }
 0x551   :  { %v457_v42 = vadd.f32 %v455_v41, %v451_v40 }
 0x553   :  { %1205 = vtanh.f32 %v457_v42  ;;  %v559_v59 = vrot.slane %v457_v42, 6 }
 0x55d   :  { %v1206_v45 = vpop.eup %1205 }
 0x55e   :  { %v1426_v46 = vmul.f32 %v1206_v45, %v447_v44 }
 0x560   :  { %v468_v47 = vrot.slane %v1426_v46, 4 }
 0x562   :  { %469 = vrot.lane.b32.xlu1 %v468_v47, %s1292_s1 }
 0x5d4   :  { %v470_v48 = vpop.permute.xlu1 %469 }
 0x5d5   :  { %1040 = vmatmul.mubr.msk.f32.vlgmr.msra.gmra.mrb[6].mxu0 %vm151_vm3, %v470_v48 }
 0x5d6   :  { %1136 = vmatpush1.bf16.msra.mxu0 %v1336_v8  ;;  %746 = vmatprep.mubr.f32.mxu0 %v1291_v0 }
 0x5d7   :  { %1138 = vmatprep.subr.bf16.mxu0 %v1338_v9 }
 0x5da   :  { %1140 = vmatpush1.bf16.msra.mxu0 %v1342_v16 }
 0x5db   :  { %1142 = vmatprep.subr.bf16.mxu0 %v1345_v22 }
 0x5de   :  { %1144 = vmatpush1.bf16.msra.mxu0 %v1348_v32 }
 0x5df   :  { %1146 = vmatprep.subr.bf16.mxu0 %v1351_v33 }
 0x5e2   :  { %1148 = vmatpush1.bf16.msra.mxu0 %v1354_v37 }
 0x5e3   :  { %1166 = vmatprep.subr.bf16.mxu0 %v1334_v4 }
 0x6a8   :  { %v539_v49 = vpop.f32.mrb[6].mxu0 }
 0x6a9   :  { %v546_v50 = vrot.slane %v539_v49, 2  ;;  %v541_v51 = vpop.f32.mrb[7].mxu0 }
 0x6aa   :  { %v547_v52 = vrot.slane %v541_v51, 2 }
 0x6ab   :  { %v550_v53 = vadd.f32 %v546_v50, %v1380_v38 }
 0x6ac   :  { %v551_v54 = vadd.f32 %v547_v52, %v1382_v39 }
 0x6ad   :  { %1207 = vtanh.f32 %v550_v53 }
 0x6ae   :  { %1209 = vtanh.f32 %v551_v54 }
 0x6b7   :  { %v1208_v55 = vpop.eup %1207 }
 0x6b8   :  { %v554_v56 = vmul.f32 0.5, %v1208_v55  ;;  %v1210_v61 = vpop.eup %1209 }
 0x6b9   :  { %v556_v2 = vmul.f32 0.5, %v1210_v61 }
 0x6ba   :  { %v555_v60 = vadd.f32 0.5, %v554_v56 }
 0x6bb   :  { %v557_v3 = vadd.f32 0.5, %v556_v2 }
 0x6bc   :  { %v562_v62 = vmul.f32 %v1210_v61, %v555_v60  ;;  %v561_v63 = vmul.f32 %v559_v59, %v555_v60 }
 0x6be   :  { %564 = vrot.lane.b32.xlu0 %v562_v62, %s1292_s1 }
 0x730   :  { %v565_v4 = vpop.permute.xlu0 %564 }
 0x731   :  { %v567_v1 = vadd.f32 %v565_v4, %v561_v63 }
 0x733   :  { %1211 = vtanh.f32 %v567_v1  ;;  %v663_v15 = vrot.slane %v567_v1, 6 }
 0x73d   :  { %v1212_v5 = vpop.eup %1211 }
 0x73e   :  { %v1443_v38 = vmul.f32 %v1212_v5, %v557_v3 }
 0x740   :  { %v578_v39 = vrot.slane %v1443_v38, 6 }
 0x742   :  { %579 = vrot.lane.b32.xlu1 %v578_v39, %s1292_s1 }
 0x7b4   :  { %v580_v6 = vpop.permute.xlu1 %579 }
 0x7b5   :  { %1041 = vmatmul.mubr.msk.f32.vlgmr.msra.gmra.mrb[4].mxu1 %vm151_vm3, %v580_v6 }
 0x7b6   :  { %1152 = vmatpush1.bf16.msra.mxu1 %v1336_v8  ;;  %854 = vmatprep.mubr.f32.mxu1 %v1291_v0 }
 0x7b7   :  { %1154 = vmatprep.subr.bf16.mxu1 %v1338_v9 }
 0x7ba   :  { %1156 = vmatpush1.bf16.msra.mxu1 %v1342_v16 }
 0x7bb   :  { %1158 = vmatprep.subr.bf16.mxu1 %v1345_v22 }
 0x7be   :  { %1160 = vmatpush1.bf16.msra.mxu1 %v1348_v32 }
 0x7bf   :  { %1162 = vmatprep.subr.bf16.mxu1 %v1351_v33 }
 0x7c2   :  { %1164 = vmatpush1.bf16.msra.mxu1 %v1354_v37 }
 0x888   :  { %v649_v7 = vpop.f32.mrb[4].mxu1 }
 0x889   :  { %v654_v10 = vadd.f32 %v649_v7, %v1390_v57  ;;  %v651_v11 = vpop.f32.mrb[5].mxu1 }
 0x88a   :  { %v655_v12 = vadd.f32 %v651_v11, %v1392_v58 }
 0x88b   :  { %1213 = vtanh.f32 %v654_v10 }
 0x88c   :  { %1215 = vtanh.f32 %v655_v12 }
 0x895   :  { %v1214_v13 = vpop.eup %1213 }
 0x896   :  { %v658_v14 = vmul.f32 0.5, %v1214_v13  ;;  %v1216_v18 = vpop.eup %1215 }
 0x897   :  { %v660_v25 = vmul.f32 0.5, %v1216_v18 }
 0x898   :  { %v659_v17 = vadd.f32 0.5, %v658_v14 }
 0x899   :  { %v661_v26 = vadd.f32 0.5, %v660_v25 }
 0x89a   :  { %v666_v20 = vmul.f32 %v1216_v18, %v659_v17  ;;  %v665_v21 = vmul.f32 %v663_v15, %v659_v17 }
 0x89c   :  { %668 = vrot.lane.b32.xlu0 %v666_v20, %s1292_s1 }
 0x90e   :  { %v669_v23 = vpop.permute.xlu0 %668 }
 0x90f   :  { %v671_v24 = vadd.f32 %v669_v23, %v665_v21 }
 0x911   :  { %1217 = vtanh.f32 %v671_v24  ;;  %v768_v36 = vrot.slane %v671_v24, 6 }
 0x91b   :  { %v1218_v27 = vpop.eup %1217 }
 0x91c   :  { %v673_v28 = vmul.f32 %v1218_v27, %v661_v26 }
 0x91e   :  { %675 = vrot.lane.b32.xlu1 %v673_v28, %s1292_s1 }
 0x990   :  { %v1460_v29 = vpop.permute.xlu1 %675 }
 0x991   :  { %1042 = vmatmul.mubr.msk.f32.vlgmr.msra.gmra.mrb[8].mxu0 %vm151_vm3, %v1460_v29 }
 0x992   :  { %1168 = vmatpush1.bf16.msra.mxu0 %v1336_v8  ;;  %962 = vmatprep.mubr.f32.mxu0 %v1291_v0 }
 0x993   :  { %1170 = vmatprep.subr.bf16.mxu0 %v1338_v9 }
 0x996   :  { %1172 = vmatpush1.bf16.msra.mxu0 %v1342_v16 }
 0x997   :  { %1174 = vmatprep.subr.bf16.mxu0 %v1345_v22 }
 0x99a   :  { %1176 = vmatpush1.bf16.msra.mxu0 %v1348_v32 }
 0x99b   :  { %1178 = vmatprep.subr.bf16.mxu0 %v1351_v33 }
 0x99e   :  { %1180 = vmatpush1.bf16.msra.mxu0 %v1354_v37 }
 0xa64   :  { %v748_v30 = vpop.f32.mrb[8].mxu0 }
 0xa65   :  { %v755_v31 = vrot.slane %v748_v30, 6  ;;  %v750_v34 = vpop.f32.mrb[9].mxu0 }
 0xa66   :  { %v756_v35 = vrot.slane %v750_v34, 6  ;;  %v1004_v34 = vlaneseq }
 0xa67   :  { %v759_v8 = vadd.f32 %v755_v31, %v1390_v57 }
 0xa68   :  { %v760_v0 = vadd.f32 %v756_v35, %v1392_v58  ;;  %v1005_v35 = vshrl.u32 %v1004_v34, 7 }
 0xa69   :  { %1219 = vtanh.f32 %v759_v8 }
 0xa6a   :  { %1221 = vtanh.f32 %v760_v0  ;;  %v1006_v0 = vsub.s32 0, %v1005_v35 }
 0xa73   :  { %v1220_v9 = vpop.eup %1219 }
 0xa74   :  { %v763_v16 = vmul.f32 0.5, %v1220_v9  ;;  %v1222_v40 = vpop.eup %1221  ;;  %v64_v9 = vld [vmem:[#allocation5 + $0xc0] ss:$8 sm:$0x3] }
 0xa75   :  { %v765_v42 = vmul.f32 0.5, %v1222_v40 }
 0xa76   :  { %v764_v22 = vadd.f32 0.5, %v763_v16  ;;  %v1007_v16 = vrot.slane %v64_v9, %v1006_v0 }
 0xa77   :  { %v766_v43 = vadd.f32 0.5, %v765_v42 }
 0xa78   :  { %v771_v32 = vmul.f32 %v1222_v40, %v764_v22  ;;  %v770_v41 = vmul.f32 %v768_v36, %v764_v22 }
 0xa7a   :  { %773 = vrot.lane.b32.xlu0 %v771_v32, %s1292_s1 }
 0xaec   :  { %v774_v33 = vpop.permute.xlu0 %773 }
 0xaed   :  { %v776_v37 = vadd.f32 %v774_v33, %v770_v41 }
 0xaef   :  { %1223 = vtanh.f32 %v776_v37  ;;  %v876_v59 = vrot.slane %v776_v37, 6 }
 0xaf9   :  { %v1224_v44 = vpop.eup %1223 }
 0xafa   :  { %v1475_v45 = vmul.f32 %v1224_v44, %v766_v43 }
 0xafc   :  { %v785_v47 = vrot.slane %v1475_v45, 2 }
 0xafe   :  { %786 = vrot.lane.b32.xlu1 %v785_v47, %s1292_s1 }
 0xb70   :  { %v787_v48 = vpop.permute.xlu1 %786 }
 0xb71   :  { %1043 = vmatmul.mubr.msk.f32.vlgmr.msra.gmra.mrb[6].mxu1 %vm151_vm3, %v787_v48 }
 0xc44   :  { %v856_v49 = vpop.f32.mrb[6].mxu1 }
 0xc45   :  { %v863_v50 = vrot.slane %v856_v49, 4  ;;  %v858_v51 = vpop.f32.mrb[7].mxu1 }
 0xc46   :  { %v864_v52 = vrot.slane %v858_v51, 4 }
 0xc47   :  { %v867_v53 = vadd.f32 %v863_v50, %v1390_v57 }
 0xc48   :  { %v868_v54 = vadd.f32 %v864_v52, %v1392_v58 }
 0xc49   :  { %1225 = vtanh.f32 %v867_v53 }
 0xc4a   :  { %1227 = vtanh.f32 %v868_v54 }
 0xc53   :  { %v1226_v55 = vpop.eup %1225 }
 0xc54   :  { %v871_v56 = vmul.f32 0.5, %v1226_v55  ;;  %v1228_v61 = vpop.eup %1227 }
 0xc55   :  { %v873_v2 = vmul.f32 0.5, %v1228_v61 }
 0xc56   :  { %v872_v60 = vadd.f32 0.5, %v871_v56 }
 0xc57   :  { %v874_v3 = vadd.f32 0.5, %v873_v2 }
 0xc58   :  { %v879_v62 = vmul.f32 %v1228_v61, %v872_v60  ;;  %v878_v63 = vmul.f32 %v876_v59, %v872_v60 }
 0xc5a   :  { %881 = vrot.lane.b32.xlu0 %v879_v62, %s1292_s1 }
 0xccc   :  { %v882_v4 = vpop.permute.xlu0 %881 }
 0xccd   :  { %v884_v1 = vadd.f32 %v882_v4, %v878_v63 }
 0xccf   :  { %1229 = vtanh.f32 %v884_v1  ;;  %v984_v21 = vrot.slane %v884_v1, 6 }
 0xcd9   :  { %v1230_v5 = vpop.eup %1229 }
 0xcda   :  { %v886_v39 = vmul.f32 %v1230_v5, %v874_v3 }
 0xcdc   :  { %v893_v6 = vrot.slane %v886_v39, 4 }
 0xcde   :  { %894 = vrot.lane.b32.xlu1 %v893_v6, %s1292_s1 }
 0xce2   :  { %351 = vrot.lane.b32.xlu1 %v1409_v19, %s1292_s1 }
 0xce6   :  { %571 = vrot.lane.b32.xlu1 %v1443_v38, %s1292_s1 }
 0xcea   :  { %888 = vrot.lane.b32.xlu1 %v886_v39, %s1292_s1 }
 0xd50   :  { %v895_v7 = vpop.permute.xlu1 %894 }
 0xd51   :  { %1044 = vmatmul.mubr.msk.f32.vlgmr.msra.gmra.mrb[10].mxu0 %vm151_vm3, %v895_v7 }
 0xd54   :  { %v352_v10 = vpop.permute.xlu1 %351 }
 0xd55   :  { %355 = vst.msk [vmem:[#allocation2] sm:$0xc] %vm354_vm4, %v352_v10 }
 0xd56   :  { %357 = vst.msk [vmem:[#allocation2 + $0xa] sm:$0xc] %vm356_vm5, %v352_v10 }
 0xd58   :  { %v572_v11 = vpop.permute.xlu1 %571 }
 0xd59   :  { %575 = vst.msk [vmem:[#allocation2] sm:$0xc0] %vm574_vm6, %v572_v11 }
 0xd5a   :  { %577 = vst.msk [vmem:[#allocation2 + $0x2] sm:$0xc0] %vm576_vm7, %v572_v11 }
 0xd5b   :  { %678 = vst.msk [vmem:[#allocation2 + $0x8] sm:$0x3] %vm247_vm1, %v1460_v29 }
 0xd5c   :  { %679 = vst.msk [vmem:[#allocation2 + $0x6] sm:$0x3] %vm249_vm2, %v1460_v29  ;;  %v889_v19 = vpop.permute.xlu1 %888 }
 0xd5d   :  { %891 = vst.msk [vmem:[#allocation2 + $0x8] sm:$0x30] %vm464_vm8, %v889_v19 }
 0xd5e   :  { %892 = vst.msk [vmem:[#allocation2 - $0x2] sm:$0x30] %vm466_vm9, %v889_v19 }
 0xe24   :  { %v964_v38 = vpop.f32.mrb[10].mxu0 }
 0xe25   :  { %v971_v12 = vrot.slane %v964_v38, 2  ;;  %v966_v13 = vpop.f32.mrb[11].mxu0 }
 0xe26   :  { %v972_v14 = vrot.slane %v966_v13, 2 }
 0xe27   :  { %v975_v15 = vadd.f32 %v971_v12, %v1390_v57 }
 0xe28   :  { %v976_v17 = vadd.f32 %v972_v14, %v1392_v58 }
 0xe29   :  { %1231 = vtanh.f32 %v975_v15 }
 0xe2a   :  { %1233 = vtanh.f32 %v976_v17 }
 0xe33   :  { %v1232_v18 = vpop.eup %1231 }
 0xe34   :  { %v979_v20 = vmul.f32 0.5, %v1232_v18  ;;  %v1234_v24 = vpop.eup %1233 }
 0xe35   :  { %v981_v29 = vmul.f32 0.5, %v1234_v24 }
 0xe36   :  { %v980_v23 = vadd.f32 0.5, %v979_v20 }
 0xe37   :  { %v982_v30 = vadd.f32 0.5, %v981_v29 }
 0xe38   :  { %v987_v25 = vmul.f32 %v1234_v24, %v980_v23  ;;  %v986_v26 = vmul.f32 %v984_v21, %v980_v23 }
 0xe3a   :  { %989 = vrot.lane.b32.xlu0 %v987_v25, %s1292_s1 }
 0xe3e   :  { %461 = vrot.lane.b32.xlu0 %v1426_v46, %s1292_s1 }
 0xe42   :  { %780 = vrot.lane.b32.xlu0 %v1475_v45, %s1292_s1 }
 0xeac   :  { %v990_v57 = vpop.permute.xlu0 %989 }
 0xead   :  { %v992_v27 = vadd.f32 %v990_v57, %v986_v26 }
 0xeaf   :  { %1235 = vtanh.f32 %v992_v27 }
 0xeb0   :  { %v462_v58 = vpop.permute.xlu0 %461 }
 0xeb1   :  { %465 = vst.msk [vmem:[#allocation2] sm:$0x30] %vm464_vm8, %v462_v58 }
 0xeb2   :  { %467 = vst.msk [vmem:[#allocation2 + $0x6] sm:$0x30] %vm466_vm9, %v462_v58 }
 0xeb4   :  { %v781_v28 = vpop.permute.xlu0 %780 }
 0xeb5   :  { %783 = vst.msk [vmem:[#allocation2 + $0x8] sm:$0xc] %vm354_vm4, %v781_v28 }
 0xeb6   :  { %784 = vst.msk [vmem:[#allocation2 + $0x2] sm:$0xc] %vm356_vm5, %v781_v28 }
 0xeb9   :  { %v1236_v31 = vpop.eup %1235 }
 0xeba   :  { %v994_v46 = vmul.f32 %v1236_v31, %v982_v30 }
 0xebc   :  { %996 = vrot.lane.b32.xlu0 %v994_v46, %s1292_s1 }
 0xf2e   :  { %v997_v8 = vpop.permute.xlu0 %996 }
 0xf2f   :  { %999 = vst.msk [vmem:[#allocation2 + $0x8] sm:$0xc0] %vm574_vm6, %v997_v8 }
 0xf30   :  { %1000 = vst.msk [vmem:[#allocation2 - $0x6] sm:$0xc0] %vm576_vm7, %v997_v8 }
 0xf36   :  { %v1002_v22 = vld [vmem:[#allocation2 + $0x8] sm:$0xff] }
 0xf37   :  { %v1001_v36 = vld [vmem:[#allocation2] sm:$0xff]  ;;  %v1010_v32 = vmul.f32 %v1007_v16, %v1002_v22 }
 0xf38   :  { %v1009_v40 = vmul.f32 %v1007_v16, %v1001_v36 }
 0xf39   :  { %v1014_v33 = vsel %vm151_vm3, %v1010_v32, 0.0 }
 0xf3a   :  { %v1011_v41 = vsel %vm151_vm3, %v1009_v40, 0.0  ;;  %1015 = vadd.xlane.f32.xlu0 %v1014_v33 }
 0xf3b   :  { %1012 = vadd.xlane.f32.xlu1 %v1011_v41 }
 0xfc7   :  { %v1016_v42 = vpop.xlane.xlu0 %1015 }
 0xfc8   :  { %v1013_v37 = vpop.xlane.xlu1 %1012  ;;  %v1018_v44 = vadd.f32 %v1016_v42, %v1007_v16 }
 0xfc9   :  { %v1017_v43 = vadd.f32 %v1013_v37, %v1007_v16 }
 0xfca   :  { %1023 = vrot.lane.b32.xlu1 %v1018_v44, %s1292_s1 }
 0xfcb   :  { %1021 = vrot.lane.b32.xlu0 %v1017_v43, %s1292_s1 }
0x103c   :  { %v1024_v45 = vpop.permute.xlu1 %1023 }
0x103d   :  { %v1022_v47 = vpop.permute.xlu0 %1021  ;;  %1029 = vst.msk [vmem:[%s1526_s2 + $0x8] sm:$0xff] %vm1027_vm10, %v1024_v45 }
0x103e   :  { %1028 = vst.msk [vmem:[%s1526_s2] sm:$0xff] %vm1027_vm10, %v1022_v47 }
0x103f   :  { %1034 = vsyncpa [#allocation4], 1 }
0x1040   :  { %1035 = vsyncpa [#allocation6], 1 }

</bundles_post_ra>
